<compile_context>
chip_gen: v6e
topology: v6e:2x2x1
jax: 0.10.0
libtpu: 0.0.40
codegen_flags: <defaults>
</compile_context>

<pallas_src>
import math

import jax
import jax.numpy as jnp
from jax.experimental import pallas as pl
from jax.experimental.pallas import tpu as pltpu

HIDDEN = 256
K_PAD = 128   # padded fc1 contraction dim (lane-aligned)
N_PAD = 128   # padded fc3 output dim (lane-dense stores)


def _round_up(x, m):
    return (x + m - 1) // m * m


def _qnet_kernel(x_ref, w1_ref, b1_ref, w2_ref, b2_ref, w3_ref, b3_ref, o_ref):
    """One batch tile of the 3-layer MLP.

    Matmuls run on the MXU with bf16 operands and f32 accumulation; the
    bias-add / ReLU epilogues stay in f32 on the VPU.
    """
    x = x_ref[...]                                             # (tile_B, K_PAD) bf16

    # fc1 + relu
    h1 = jnp.dot(x, w1_ref[...],
                 preferred_element_type=jnp.float32) + b1_ref[...]
    h1 = jnp.maximum(h1, 0.0)

    # fc2 + relu
    h2 = jnp.dot(h1.astype(jnp.bfloat16), w2_ref[...],
                 preferred_element_type=jnp.float32) + b2_ref[...]
    h2 = jnp.maximum(h2, 0.0)

    # fc3 (no activation) — lane-dense padded output block
    out = jnp.dot(h2.astype(jnp.bfloat16), w3_ref[...],
                  preferred_element_type=jnp.float32) + b3_ref[...]
    o_ref[...] = out.astype(o_ref.dtype)


def linear_qnet_forward(x, params, output_size, *, tile_b=512):
    """x: (B, input_size) float32. Returns (B, output_size) float32."""
    w1, b1 = params["w1"], params["b1"]   # (K_PAD, 256) bf16, (1, 256) f32
    w2, b2 = params["w2"], params["b2"]   # (256, 256)  bf16, (1, 256) f32
    w3, b3 = params["w3"], params["b3"]   # (256, N_PAD) bf16, (1, N_PAD) f32

    B, K = x.shape

    # Zero-pad the fc1 contraction dim to a lane-aligned width and cast to the
    # MXU operand dtype in the same op (exact w.r.t. the bf16-operand math).
    x_p = jnp.pad(x.astype(jnp.bfloat16), ((0, 0), (0, K_PAD - K)))

    # Batch tile: whole (8-aligned) batch if small, else tile_b rows per step.
    if B <= tile_b:
        tb = _round_up(max(B, 8), 8)
    else:
        tb = tile_b
    b_pad = _round_up(B, tb)
    if b_pad != B:
        x_p = jnp.pad(x_p, ((0, b_pad - B), (0, 0)))
    grid = (b_pad // tb,)

    # Full-array blocks with constant index maps: weights/biases stay
    # VMEM-resident while only x / out tiles pipeline over the grid.
    def const(a):
        return pl.BlockSpec(a.shape, lambda i: (0,) * a.ndim)

    flops = 2 * b_pad * (K_PAD * HIDDEN + HIDDEN * HIDDEN + HIDDEN * N_PAD)
    bytes_accessed = (x_p.size * 2 + b_pad * N_PAD * 4
                      + (w1.size + w2.size + w3.size) * 2
                      + (b1.size + b2.size + b3.size) * 4)

    out = pl.pallas_call(
        _qnet_kernel,
        out_shape=jax.ShapeDtypeStruct((b_pad, N_PAD), jnp.float32),
        grid=grid,
        in_specs=[
            pl.BlockSpec((tb, K_PAD), lambda i: (i, 0)),
            const(w1), const(b1), const(w2), const(b2), const(w3), const(b3),
        ],
        out_specs=pl.BlockSpec((tb, N_PAD), lambda i: (i, 0)),
        compiler_params=pltpu.CompilerParams(
            dimension_semantics=("parallel",),       # split batch tiles across TCs (v7x)
            vmem_limit_bytes=32 * 1024 * 1024,       # safe for v7x's 64 MiB VMEM
        ),
        cost_estimate=pl.CostEstimate(
            flops=flops, transcendentals=0, bytes_accessed=bytes_accessed),
    )(x_p, w1, b1, w2, b2, w3, b3)

    # Strip batch padding and the zero-padded output columns.
    return out[:B, :output_size]


def init_linear_qnet(key, input_size, output_size, hidden=HIDDEN):
    """Matches PyTorch nn.Linear defaults: U(-1/sqrt(fan_in), 1/sqrt(fan_in))
    for weight and bias (fan_in taken before padding). Weights are stored as
    (in_features, out_features) — i.e. PyTorch W transposed — zero-padded to
    lane-aligned shapes and cast to bf16; biases stay f32.
    """
    def linear(k, fan_in, fan_out):
        kw, kb = jax.random.split(k)
        bound = 1.0 / math.sqrt(fan_in)
        w = jax.random.uniform(kw, (fan_in, fan_out), jnp.float32, -bound, bound)
        b = jax.random.uniform(kb, (1, fan_out), jnp.float32, -bound, bound)
        return w, b

    k1, k2, k3 = jax.random.split(key, 3)
    w1, b1 = linear(k1, input_size, hidden)
    w2, b2 = linear(k2, hidden, hidden)
    w3, b3 = linear(k3, hidden, output_size)

    # Zero-pad fc1 rows (K) and fc3 cols (N) — exact for the matmul / bias-add.
    w1 = jnp.pad(w1, ((0, K_PAD - input_size), (0, 0))).astype(jnp.bfloat16)
    w2 = w2.astype(jnp.bfloat16)
    w3 = jnp.pad(w3, ((0, 0), (0, N_PAD - output_size))).astype(jnp.bfloat16)
    b3 = jnp.pad(b3, ((0, 0), (0, N_PAD - output_size)))

    return {"w1": w1, "b1": b1, "w2": w2, "b2": b2, "w3": w3, "b3": b3}


if __name__ == "__main__":
    # Snake-game Q-net: state vector of 11 features, 3 actions.
    batch, input_size, output_size = 8, 11, 3

    key = jax.random.PRNGKey(0)
    kx, kp = jax.random.split(key)
    x = jax.random.normal(kx, (batch, input_size), jnp.float32)
    params = init_linear_qnet(kp, input_size, output_size)

    out = linear_qnet_forward(x, params, output_size)
    out = jax.block_until_ready(out)

    # Reference in plain JAX with the same bf16-operand / f32-accumulate math.
    w1_real = params["w1"][:input_size]                 # padded rows are zero
    w3_real = params["w3"][:, :output_size]
    b3_real = params["b3"][:, :output_size]
    ref = jnp.dot(x.astype(jnp.bfloat16), w1_real,
                  preferred_element_type=jnp.float32) + params["b1"]
    ref = jnp.maximum(ref, 0.0)
    ref = jnp.dot(ref.astype(jnp.bfloat16), params["w2"],
                  preferred_element_type=jnp.float32) + params["b2"]
    ref = jnp.maximum(ref, 0.0)
    ref = jnp.dot(ref.astype(jnp.bfloat16), w3_real,
                  preferred_element_type=jnp.float32) + b3_real

    assert out.shape == (batch, output_size)
    assert jnp.allclose(out, ref, atol=2e-3, rtol=2e-3)

    print("KERNEL_OK")
</pallas_src>

<mosaic_0001>
module attributes {stable_mosaic.version = 11 : i64} {
  func.func @_qnet_kernel(%arg0: i32, %arg1: memref<8x128xbf16, #tpu.memory_space<vmem>>, %arg2: memref<128x256xbf16, #tpu.memory_space<vmem>>, %arg3: memref<1x256xf32, #tpu.memory_space<vmem>>, %arg4: memref<256x256xbf16, #tpu.memory_space<vmem>>, %arg5: memref<1x256xf32, #tpu.memory_space<vmem>>, %arg6: memref<256x128xbf16, #tpu.memory_space<vmem>>, %arg7: memref<1x128xf32, #tpu.memory_space<vmem>>, %arg8: memref<8x128xf32, #tpu.memory_space<vmem>>) attributes {dimension_semantics = [#tpu.dimension_semantics<parallel>], iteration_bounds = array<i64: 1>, scalar_prefetch = 0 : i64, scratch_operands = 0 : i64, tpu.core_type = #tpu.core_type<tc>, window_params = [{transform_indices = @transform_0, window_bounds = array<i64: 8, 128>}, {pipeline_mode = #tpu.pipeline_mode<synchronous>, transform_indices = @transform_1, window_bounds = array<i64: 128, 256>}, {pipeline_mode = #tpu.pipeline_mode<synchronous>, transform_indices = @transform_2, window_bounds = array<i64: 1, 256>}, {pipeline_mode = #tpu.pipeline_mode<synchronous>, transform_indices = @transform_3, window_bounds = array<i64: 256, 256>}, {pipeline_mode = #tpu.pipeline_mode<synchronous>, transform_indices = @transform_4, window_bounds = array<i64: 1, 256>}, {pipeline_mode = #tpu.pipeline_mode<synchronous>, transform_indices = @transform_5, window_bounds = array<i64: 256, 128>}, {pipeline_mode = #tpu.pipeline_mode<synchronous>, transform_indices = @transform_6, window_bounds = array<i64: 1, 128>}, {transform_indices = @transform_7, window_bounds = array<i64: 8, 128>}]} {
    %c0 = arith.constant 0 : index
    %c0_0 = arith.constant 0 : index
    %0 = vector.load %arg1[%c0, %c0_0] : memref<8x128xbf16, #tpu.memory_space<vmem>>, vector<8x128xbf16>
    %c0_1 = arith.constant 0 : index
    %c0_2 = arith.constant 0 : index
    %1 = vector.load %arg2[%c0_1, %c0_2] : memref<128x256xbf16, #tpu.memory_space<vmem>>, vector<128x256xbf16>
    %cst = arith.constant dense<0.000000e+00> : vector<8x256xf32>
    %2 = tpu.matmul %0, %1, %cst {dimension_numbers = #tpu.dot_dimension_numbers<[1], [0], [0], [1], [0, 0, 1, 1], [], []>} : vector<8x128xbf16>, vector<128x256xbf16>, vector<8x256xf32> -> vector<8x256xf32>
    %c0_3 = arith.constant 0 : index
    %c0_4 = arith.constant 0 : index
    %3 = vector.load %arg3[%c0_3, %c0_4] : memref<1x256xf32, #tpu.memory_space<vmem>>, vector<1x256xf32>
    %4 = vector.broadcast %3 : vector<1x256xf32> to vector<8x256xf32>
    %5 = arith.addf %2, %4 : vector<8x256xf32>
    %cst_5 = arith.constant 0.000000e+00 : f32
    %6 = vector.broadcast %cst_5 : f32 to vector<8x256xf32>
    %7 = arith.maximumf %5, %6 : vector<8x256xf32>
    %8 = arith.truncf %7 : vector<8x256xf32> to vector<8x256xbf16>
    %c0_6 = arith.constant 0 : index
    %c0_7 = arith.constant 0 : index
    %9 = vector.load %arg4[%c0_6, %c0_7] : memref<256x256xbf16, #tpu.memory_space<vmem>>, vector<256x256xbf16>
    %cst_8 = arith.constant dense<0.000000e+00> : vector<8x256xf32>
    %10 = tpu.matmul %8, %9, %cst_8 {dimension_numbers = #tpu.dot_dimension_numbers<[1], [0], [0], [1], [0, 0, 1, 1], [], []>} : vector<8x256xbf16>, vector<256x256xbf16>, vector<8x256xf32> -> vector<8x256xf32>
    %c0_9 = arith.constant 0 : index
    %c0_10 = arith.constant 0 : index
    %11 = vector.load %arg5[%c0_9, %c0_10] : memref<1x256xf32, #tpu.memory_space<vmem>>, vector<1x256xf32>
    %12 = vector.broadcast %11 : vector<1x256xf32> to vector<8x256xf32>
    %13 = arith.addf %10, %12 : vector<8x256xf32>
    %cst_11 = arith.constant 0.000000e+00 : f32
    %14 = vector.broadcast %cst_11 : f32 to vector<8x256xf32>
    %15 = arith.maximumf %13, %14 : vector<8x256xf32>
    %16 = arith.truncf %15 : vector<8x256xf32> to vector<8x256xbf16>
    %c0_12 = arith.constant 0 : index
    %c0_13 = arith.constant 0 : index
    %17 = vector.load %arg6[%c0_12, %c0_13] : memref<256x128xbf16, #tpu.memory_space<vmem>>, vector<256x128xbf16>
    %cst_14 = arith.constant dense<0.000000e+00> : vector<8x128xf32>
    %18 = tpu.matmul %16, %17, %cst_14 {dimension_numbers = #tpu.dot_dimension_numbers<[1], [0], [0], [1], [0, 0, 1, 1], [], []>} : vector<8x256xbf16>, vector<256x128xbf16>, vector<8x128xf32> -> vector<8x128xf32>
    %c0_15 = arith.constant 0 : index
    %c0_16 = arith.constant 0 : index
    %19 = vector.load %arg7[%c0_15, %c0_16] : memref<1x128xf32, #tpu.memory_space<vmem>>, vector<1x128xf32>
    %20 = vector.broadcast %19 : vector<1x128xf32> to vector<8x128xf32>
    %21 = arith.addf %18, %20 : vector<8x128xf32>
    %c0_17 = arith.constant 0 : index
    %c0_18 = arith.constant 0 : index
    %22 = vector.load %arg8[%c0_17, %c0_18] : memref<8x128xf32, #tpu.memory_space<vmem>>, vector<8x128xf32>
    tpu.vector_store %arg8[%c0_17, %c0_18], %21 {strides = array<i32>} : memref<8x128xf32, #tpu.memory_space<vmem>>, vector<8x128xf32>,
    return
  }
  func.func @transform_0(%arg0: i32) -> (i32, i32) {
    %c0_i32 = arith.constant 0 : i32
    %c0_i32_0 = arith.constant 0 : i32
    return %arg0, %c0_i32 : i32, i32
  }
  func.func @transform_1(%arg0: i32) -> (i32, i32) {
    %c0_i32 = arith.constant 0 : i32
    %c0_i32_0 = arith.constant 0 : i32
    %c0_i32_1 = arith.constant 0 : i32
    return %c0_i32, %c0_i32_0 : i32, i32
  }
  func.func @transform_2(%arg0: i32) -> (i32, i32) {
    %c0_i32 = arith.constant 0 : i32
    %c0_i32_0 = arith.constant 0 : i32
    %c0_i32_1 = arith.constant 0 : i32
    return %c0_i32, %c0_i32_0 : i32, i32
  }
  func.func @transform_3(%arg0: i32) -> (i32, i32) {
    %c0_i32 = arith.constant 0 : i32
    %c0_i32_0 = arith.constant 0 : i32
    %c0_i32_1 = arith.constant 0 : i32
    return %c0_i32, %c0_i32_0 : i32, i32
  }
  func.func @transform_4(%arg0: i32) -> (i32, i32) {
    %c0_i32 = arith.constant 0 : i32
    %c0_i32_0 = arith.constant 0 : i32
    %c0_i32_1 = arith.constant 0 : i32
    return %c0_i32, %c0_i32_0 : i32, i32
  }
  func.func @transform_5(%arg0: i32) -> (i32, i32) {
    %c0_i32 = arith.constant 0 : i32
    %c0_i32_0 = arith.constant 0 : i32
    %c0_i32_1 = arith.constant 0 : i32
    return %c0_i32, %c0_i32_0 : i32, i32
  }
  func.func @transform_6(%arg0: i32) -> (i32, i32) {
    %c0_i32 = arith.constant 0 : i32
    %c0_i32_0 = arith.constant 0 : i32
    %c0_i32_1 = arith.constant 0 : i32
    return %c0_i32, %c0_i32_0 : i32, i32
  }
  func.func @transform_7(%arg0: i32) -> (i32, i32) {
    %c0_i32 = arith.constant 0 : i32
    %c0_i32_0 = arith.constant 0 : i32
    return %arg0, %c0_i32 : i32, i32
  }
}

</mosaic_0001>

<bundles_post_ra>
// kernel: tpu_custom_call.1
= control target key start
LH: loop header
LB: loop body
LE: loop exit
PB: predicated region body
PF: predicated region fallthrough
CT: control target
= control target key end

     0   :  { %12 = vsyncpa [#allocation3], 0  ;;  %s1044_s0 = inlined_call_operand.hbm [shape: bf16[8,128], index: 0, kind: input, shape index: {}]   ;;  %s1045_s1 = inlined_call_operand.hbm [shape: bf16[128,256], index: 1, kind: input, shape index: {}]   ;;  %s1046_s2 = inlined_call_operand.vmem [shape: f32[1,256], index: 2, kind: input, shape index: {}]   ;;  %s1047_s3 = inlined_call_operand.hbm [shape: bf16[256,256], index: 3, kind: input, shape index: {}]   ;;  %s1048_s4 = inlined_call_operand.vmem [shape: f32[1,256], index: 4, kind: input, shape index: {}]   ;;  %s1049_s5 = inlined_call_operand.hbm [shape: bf16[256,128], index: 5, kind: input, shape index: {}]   ;;  %s1050_s6 = inlined_call_operand.vmem [shape: f32[1,128], index: 6, kind: input, shape index: {}]   ;;  %s1051_s7 = inlined_call_operand.hbm [shape: f32[8,128], index: 7, kind: output, shape index: {}]  }
   0x1   :  { %13 = vsyncpa [#allocation6], 0 }
   0x2   :  { %14 = vsyncpa [#allocation9], 0 }
   0x3   :  { %15 = vsyncpa [#allocation4], 0  ;;  %s970_s24 = smov [#allocation5]  }
   0x4   :  { %s31_s25 = sshll.u32 %s970_s24, 4  ;;  %s32_s25 = int_to_ptr.vmem [resolvable:$true] %s31_s25 }
   0x5   :  { %s870_s26 = scalar_lea.vmem %s32_s25, 2048  ;;  %p875_p1 = scmp.lt.s32.totalorder %s32_s25, %s32_s25 }
   0x6   :  { %p871_p0 = scmp.ne.s32.totalorder %s32_s25, %s870_s26  ;;  %p876_p2 = scmp.lt.s32.totalorder %s870_s26, %s870_s26 }
   0x8   :  { %p877_p3 = por %p876_p2, %p875_p1 }
   0xa   :  { %p878_p4 = pnand %p877_p3, %p871_p0 }
   0xc   :  { %881 = shalt.err (!%p878_p4)
}
   0xd   :  { %s971_s27 = smov 128   ;;  %s972_s28 = smov 8  }
   0xe   :  { %37 = dma.hbm_to_vmem [thread:$0]  %s1045_s1, 2048, %s32_s25, [#allocation6], %s971_s27, %s971_s27, %s972_s28  }
   0xf   :  { %s973_s8 = smov [#allocation2]   ;;  %s974_s10 = smov [#allocation7]  }
  0x10   :  { %s22_s9 = sshll.u32 %s973_s8, 4  ;;  %s45_s11 = sshll.u32 %s974_s10, 4  ;;  %s23_s9 = int_to_ptr.vmem [resolvable:$true] %s22_s9  ;;  %s46_s11 = int_to_ptr.vmem [resolvable:$true] %s45_s11 }
  0x11   :  { %s890_s12 = scalar_lea.vmem %s23_s9, 64  ;;  %p895_p6 = scmp.lt.s32.totalorder %s23_s9, %s23_s9 }
  0x12   :  { %p891_p5 = scmp.ne.s32.totalorder %s23_s9, %s890_s12  ;;  %p896_p7 = scmp.lt.s32.totalorder %s890_s12, %s890_s12 }
  0x14   :  { %p897_p8 = por %p896_p7, %p895_p6 }
  0x16   :  { %p898_p9 = pnand %p897_p8, %p891_p5 }
  0x18   :  { %901 = shalt.err (!%p898_p9)
}
  0x19   :  { %25 = dma.hbm_to_vmem [thread:$0]  %s1044_s0, 64, %s23_s9, [#allocation3]  }
  0x1a   :  { %s910_s15 = scalar_lea.vmem %s46_s11, 4096  ;;  %p915_p11 = scmp.lt.s32.totalorder %s46_s11, %s46_s11 }
  0x1b   :  { %p911_p10 = scmp.ne.s32.totalorder %s46_s11, %s910_s15  ;;  %p916_p12 = scmp.lt.s32.totalorder %s910_s15, %s910_s15 }
  0x1d   :  { %p917_p13 = por %p916_p12, %p915_p11 }
  0x1f   :  { %p918_p0 = pnand %p917_p13, %p911_p10 }
  0x21   :  { %921 = shalt.err (!%p918_p0)
}
  0x22   :  { %51 = dma.hbm_to_vmem [thread:$0]  %s1047_s3, 4096, %s46_s11, [#allocation6], %s971_s27, %s971_s27, %s972_s28  }
  0x23   :  { %s975_s17 = smov [#allocation8]  }
  0x24   :  { %s59_s18 = sshll.u32 %s975_s17, 4  ;;  %s60_s18 = int_to_ptr.vmem [resolvable:$true] %s59_s18 }
  0x25   :  { %s930_s19 = scalar_lea.vmem %s60_s18, 2048  ;;  %p935_p2 = scmp.lt.s32.totalorder %s60_s18, %s60_s18 }
  0x26   :  { %p931_p1 = scmp.ne.s32.totalorder %s60_s18, %s930_s19  ;;  %p936_p3 = scmp.lt.s32.totalorder %s930_s19, %s930_s19 }
  0x28   :  { %p937_p4 = por %p936_p3, %p935_p2 }
  0x2a   :  { %p938_p5 = pnand %p937_p4, %p931_p1 }
  0x2c   :  { %941 = shalt.err (!%p938_p5)
}
  0x2d   :  { %s976_s0 = smov 64   ;;  %s977_s20 = smov 4  }
  0x2e   :  { %65 = dma.hbm_to_vmem [thread:$0]  %s1049_s5, 2048, %s60_s18, [#allocation9], %s976_s0, %s976_s0, %s977_s20  }
  0x2f   :  { %962 = dma.done.wait [#allocation3], 64  }
  0x30   :  { %963 = vsyncadd [#allocation3], 4294967232 }
  0x31   :  { %964 = dma.done.wait [#allocation6], 6144  }
  0x32   :  { %965 = vsyncadd [#allocation6], 4294961152 }
  0x33   :  { %966 = dma.done.wait [#allocation9], 2048  }
  0x34   :  { %967 = vsyncadd [#allocation9], 4294965248  ;;  %v978_v0 = vmov 0   ;;  %v774_v1 = vld [vmem:[#allocation5 + $0x74] ss:$8 sps:$4 sm:$0xff]   ;;  %v850_v54 = vld [vmem:[#allocation8 + $0x68] sm:$0xff]   ;;  %v100_v62 = vlaneseq }
  0x35   :  { %222 = vmatprep.mubr.bf16.mxu0 %v978_v0  ;;  %v776_v2 = vld [vmem:[#allocation5 + $0x70] ss:$8 sps:$4 sm:$0xff]   ;;  %190 = vmatprep.subr.bf16.mxu0 %v774_v1  ;;  %v777_v3 = vld [vmem:[#allocation5 + $0x64] ss:$8 sps:$4 sm:$0xff]   ;;  %v779_v4 = vld [vmem:[#allocation5 + $0x60] ss:$8 sps:$4 sm:$0xff]  }
  0x36   :  { %191 = vmatpush1.bf16.msra.mxu0 %v776_v2  ;;  %v780_v5 = vld [vmem:[#allocation5 + $0x54] ss:$8 sps:$4 sm:$0xff]   ;;  %v782_v6 = vld [vmem:[#allocation5 + $0x50] ss:$8 sps:$4 sm:$0xff]   ;;  %v783_v7 = vld [vmem:[#allocation5 + $0x44] ss:$8 sps:$4 sm:$0xff]  }
  0x37   :  { %192 = vmatprep.subr.bf16.mxu0 %v777_v3  ;;  %v785_v8 = vld [vmem:[#allocation5 + $0x40] ss:$8 sps:$4 sm:$0xff]   ;;  %v786_v9 = vld [vmem:[#allocation5 + $0x34] ss:$8 sps:$4 sm:$0xff]   ;;  %v800_v11 = vld [vmem:[#allocation7 + $0x70] ss:$8 sps:$4 sm:$0xff]  }
  0x38   :  { %v798_v10 = vld [vmem:[#allocation7 + $0x74] ss:$8 sps:$4 sm:$0xff]   ;;  %v801_v12 = vld [vmem:[#allocation7 + $0x64] ss:$8 sps:$4 sm:$0xff]   ;;  %v788_v13 = vld [vmem:[#allocation5 + $0x30] ss:$8 sps:$4 sm:$0xff]  }
  0x39   :  { %439 = vmatprep.subr.bf16.mxu1 %v798_v10  ;;  %v803_v14 = vld [vmem:[#allocation7 + $0x60] ss:$8 sps:$4 sm:$0xff]   ;;  %v804_v15 = vld [vmem:[#allocation7 + $0x54] ss:$8 sps:$4 sm:$0xff]   ;;  %v789_v16 = vld [vmem:[#allocation5 + $0x24] ss:$8 sps:$4 sm:$0xff]  }
  0x3a   :  { %193 = vmatpush1.bf16.msra.mxu0 %v779_v4  ;;  %440 = vmatpush1.bf16.msra.mxu1 %v800_v11  ;;  %v791_v17 = vld [vmem:[#allocation5 + $0x20] ss:$8 sps:$4 sm:$0xff]   ;;  %v806_v18 = vld [vmem:[#allocation7 + $0x50] ss:$8 sps:$4 sm:$0xff]   ;;  %v807_v19 = vld [vmem:[#allocation7 + $0x44] ss:$8 sps:$4 sm:$0xff]  }
  0x3b   :  { %194 = vmatprep.subr.bf16.mxu0 %v780_v5  ;;  %441 = vmatprep.subr.bf16.mxu1 %v801_v12  ;;  %v792_v20 = vld [vmem:[#allocation5 + $0x14] ss:$8 sps:$4 sm:$0xff]   ;;  %v794_v21 = vld [vmem:[#allocation5 + $0x10] ss:$8 sps:$4 sm:$0xff]   ;;  %v809_v22 = vld [vmem:[#allocation7 + $0x40] ss:$8 sps:$4 sm:$0xff]  }
  0x3c   :  { %v810_v23 = vld [vmem:[#allocation7 + $0x34] ss:$8 sps:$4 sm:$0xff]   ;;  %v795_v24 = vld [vmem:[#allocation5 + $0x4] ss:$8 sps:$4 sm:$0xff]   ;;  %v797_v25 = vld [vmem:[#allocation5] ss:$8 sps:$4 sm:$0xff]  }
  0x3d   :  { %v812_v26 = vld [vmem:[#allocation7 + $0x30] ss:$8 sps:$4 sm:$0xff]   ;;  %v813_v27 = vld [vmem:[#allocation7 + $0x24] ss:$8 sps:$4 sm:$0xff]   ;;  %v81_v28 = vld [vmem:[#allocation2] sm:$0xf] }
  0x3e   :  { %195 = vmatpush1.bf16.msra.mxu0 %v782_v6  ;;  %442 = vmatpush1.bf16.msra.mxu1 %v803_v14  ;;  %v815_v29 = vld [vmem:[#allocation7 + $0x20] ss:$8 sps:$4 sm:$0xff]   ;;  %v816_v30 = vld [vmem:[#allocation7 + $0x14] ss:$8 sps:$4 sm:$0xff]   ;;  %v818_v31 = vld [vmem:[#allocation7 + $0x10] ss:$8 sps:$4 sm:$0xff]  }
  0x3f   :  { %196 = vmatprep.subr.bf16.mxu0 %v783_v7  ;;  %443 = vmatprep.subr.bf16.mxu1 %v804_v15  ;;  %v819_v32 = vld [vmem:[#allocation7 + $0x4] ss:$8 sps:$4 sm:$0xff]   ;;  %v821_v33 = vld [vmem:[#allocation7] ss:$8 sps:$4 sm:$0xff]   ;;  %v822_v34 = vld [vmem:[#allocation7 + $0xf4] ss:$8 sps:$4 sm:$0xff]  }
  0x40   :  { %v824_v35 = vld [vmem:[#allocation7 + $0xf0] ss:$8 sps:$4 sm:$0xff]   ;;  %v825_v36 = vld [vmem:[#allocation7 + $0xe4] ss:$8 sps:$4 sm:$0xff]   ;;  %v827_v37 = vld [vmem:[#allocation7 + $0xe0] ss:$8 sps:$4 sm:$0xff]  }
  0x41   :  { %v828_v38 = vld [vmem:[#allocation7 + $0xd4] ss:$8 sps:$4 sm:$0xff]   ;;  %v830_v39 = vld [vmem:[#allocation7 + $0xd0] ss:$8 sps:$4 sm:$0xff]   ;;  %v831_v40 = vld [vmem:[#allocation7 + $0xc4] ss:$8 sps:$4 sm:$0xff]  }
  0x42   :  { %197 = vmatpush1.bf16.msra.mxu0 %v785_v8  ;;  %444 = vmatpush1.bf16.msra.mxu1 %v806_v18  ;;  %v833_v41 = vld [vmem:[#allocation7 + $0xc0] ss:$8 sps:$4 sm:$0xff]   ;;  %v834_v42 = vld [vmem:[#allocation7 + $0xb4] ss:$8 sps:$4 sm:$0xff]   ;;  %v836_v43 = vld [vmem:[#allocation7 + $0xb0] ss:$8 sps:$4 sm:$0xff]  }
  0x43   :  { %198 = vmatprep.subr.bf16.mxu0 %v786_v9  ;;  %445 = vmatprep.subr.bf16.mxu1 %v807_v19  ;;  %v837_v44 = vld [vmem:[#allocation7 + $0xa4] ss:$8 sps:$4 sm:$0xff]   ;;  %v839_v45 = vld [vmem:[#allocation7 + $0xa0] ss:$8 sps:$4 sm:$0xff]   ;;  %v840_v46 = vld [vmem:[#allocation7 + $0x94] ss:$8 sps:$4 sm:$0xff]  }
  0x44   :  { %v842_v47 = vld [vmem:[#allocation7 + $0x90] ss:$8 sps:$4 sm:$0xff]   ;;  %v843_v48 = vld [vmem:[#allocation7 + $0x84] ss:$8 sps:$4 sm:$0xff]   ;;  %v845_v49 = vld [vmem:[#allocation7 + $0x80] ss:$8 sps:$4 sm:$0xff]  }
  0x45   :  { %v846_v50 = vld [vmem:[#allocation8 + $0x78] sm:$0xff]   ;;  %v848_v52 = vld [vmem:[#allocation8 + $0x70] sm:$0xff]   ;;  %v851_v55 = vld [vmem:[#allocation8 + $0x28] sm:$0xff]   ;;  %v101_v63 = vshrl.u32 %v100_v62, 7 }
  0x46   :  { %199 = vmatpush1.bf16.msra.mxu0 %v788_v13  ;;  %446 = vmatpush1.bf16.msra.mxu1 %v809_v22  ;;  %v847_v51 = vld [vmem:[#allocation8 + $0x38] sm:$0xff]   ;;  %v849_v53 = vld [vmem:[#allocation8 + $0x30] sm:$0xff]   ;;  %v852_v56 = vld [vmem:[#allocation8 + $0x60] sm:$0xff]  }
  0x47   :  { %200 = vmatprep.subr.bf16.mxu0 %v789_v16  ;;  %447 = vmatprep.subr.bf16.mxu1 %v810_v23  ;;  %v853_v57 = vld [vmem:[#allocation8 + $0x20] sm:$0xff]   ;;  %v854_v58 = vld [vmem:[#allocation8 + $0x58] sm:$0xff]   ;;  %v856_v60 = vld [vmem:[#allocation8 + $0x50] sm:$0xff]   ;;  %v102_v0 = vsub.s32 0, %v101_v63  ;;  %v106_v2 = vsub.s32 1, %v101_v63 }
  0x48   :  { %v855_v59 = vld [vmem:[#allocation8 + $0x18] sm:$0xff]   ;;  %v857_v61 = vld [vmem:[#allocation8 + $0x10] sm:$0xff]   ;;  %v858_v15 = vld [vmem:[#allocation8 + $0x48] sm:$0xff]  }
  0x49   :  { %v98_v1 = vld [vmem:[%s1046_s2] sm:$0x3]  ;;  %v859_v16 = vld [vmem:[#allocation8 + $0x8] sm:$0xff]   ;;  %v861_v18 = vld [vmem:[#allocation8] sm:$0xff]  }
  0x4a   :  { %201 = vmatpush1.bf16.msra.mxu0 %v791_v17  ;;  %448 = vmatpush1.bf16.msra.mxu1 %v812_v26  ;;  %v103_v3 = vrot.slane %v98_v1, %v102_v0  ;;  %v107_v4 = vrot.slane %v98_v1, %v106_v2  ;;  %v860_v17 = vld [vmem:[#allocation8 + $0x40] sm:$0xff]   ;;  %v267_v19 = vld [vmem:[%s1048_s4] sm:$0x3]  ;;  %s979_s4 = smov [#allocation10]  }
  0x4b   :  { %202 = vmatprep.subr.bf16.mxu0 %v792_v20  ;;  %449 = vmatprep.subr.bf16.mxu1 %v813_v27  ;;  %v272_v20 = vrot.slane %v267_v19, %v102_v0  ;;  %s666_s26 = sshll.u32 %s979_s4, 4  ;;  %s667_s26 = int_to_ptr.vmem [resolvable:$true] %s666_s26 }
  0x4c   :  { %s942_s27 = scalar_lea.vmem %s667_s26, 128  ;;  %p947_p7 = scmp.lt.s32.totalorder %s667_s26, %s667_s26 }
  0x4d   :  { %p943_p6 = scmp.ne.s32.totalorder %s667_s26, %s942_s27  ;;  %p948_p8 = scmp.lt.s32.totalorder %s942_s27, %s942_s27 }
  0x4e   :  { %203 = vmatpush1.bf16.msra.mxu0 %v794_v21  ;;  %450 = vmatpush1.bf16.msra.mxu1 %v815_v29  ;;  %v276_v21 = vrot.slane %v267_v19, %v106_v2 }
  0x4f   :  { %204 = vmatprep.subr.bf16.mxu0 %v795_v24  ;;  %451 = vmatprep.subr.bf16.mxu1 %v816_v30  ;;  %p949_p9 = por %p948_p8, %p947_p7 }
  0x51   :  { %p950_p10 = pnand %p949_p9, %p943_p6 }
  0x52   :  { %205 = vmatpush1.bf16.msra.mxu0 %v797_v25  ;;  %452 = vmatpush1.bf16.msra.mxu1 %v818_v31 }
  0x53   :  { %453 = vmatprep.subr.bf16.mxu1 %v819_v32  ;;  %742 = vmatprep.subr.bf16.mxu0 %v846_v50 }
  0x55   :  { %223 = vmatmul.mubr.bf16.vlgmr.msra.gmra.mxu0 %v81_v28 }
  0x56   :  { %454 = vmatpush1.bf16.msra.mxu1 %v821_v33  ;;  %743 = vmatpush3.bf16.msra.mxu0 %v847_v51  ;;  %v725_v33 = vld [vmem:[%s1050_s6] ss:$0 sm:$0xff] }
  0x57   :  { %455 = vmatprep.subr.bf16.mxu1 %v822_v34  ;;  %744 = vmatprep.subr.bf16.mxu0 %v848_v52 }
  0x5a   :  { %456 = vmatpush2.bf16.msra.mxu1 %v824_v35  ;;  %745 = vmatpush3.bf16.msra.mxu0 %v849_v53 }
  0x5b   :  { %457 = vmatprep.subr.bf16.mxu1 %v825_v36  ;;  %746 = vmatprep.subr.bf16.mxu0 %v850_v54 }
  0x5e   :  { %458 = vmatpush2.bf16.msra.mxu1 %v827_v37  ;;  %747 = vmatpush3.bf16.msra.mxu0 %v851_v55 }
  0x5f   :  { %459 = vmatprep.subr.bf16.mxu1 %v828_v38  ;;  %748 = vmatprep.subr.bf16.mxu0 %v852_v56 }
  0x62   :  { %460 = vmatpush2.bf16.msra.mxu1 %v830_v39  ;;  %749 = vmatpush3.bf16.msra.mxu0 %v853_v57 }
  0x63   :  { %461 = vmatprep.subr.bf16.mxu1 %v831_v40  ;;  %750 = vmatprep.subr.bf16.mxu0 %v854_v58 }
  0x66   :  { %462 = vmatpush2.bf16.msra.mxu1 %v833_v41  ;;  %751 = vmatpush3.bf16.msra.mxu0 %v855_v59 }
  0x67   :  { %463 = vmatprep.subr.bf16.mxu1 %v834_v42  ;;  %752 = vmatprep.subr.bf16.mxu0 %v856_v60 }
  0x6a   :  { %464 = vmatpush2.bf16.msra.mxu1 %v836_v43  ;;  %753 = vmatpush3.bf16.msra.mxu0 %v857_v61 }
  0x6b   :  { %465 = vmatprep.subr.bf16.mxu1 %v837_v44  ;;  %754 = vmatprep.subr.bf16.mxu0 %v858_v15 }
  0x6e   :  { %466 = vmatpush2.bf16.msra.mxu1 %v839_v45  ;;  %755 = vmatpush3.bf16.msra.mxu0 %v859_v16 }
  0x6f   :  { %467 = vmatprep.subr.bf16.mxu1 %v840_v46  ;;  %756 = vmatprep.subr.bf16.mxu0 %v860_v17 }
  0x72   :  { %468 = vmatpush2.bf16.msra.mxu1 %v842_v47  ;;  %757 = vmatpush3.bf16.msra.mxu0 %v861_v18 }
  0x73   :  { %469 = vmatprep.subr.bf16.mxu1 %v843_v48 }
  0x76   :  { %470 = vmatpush2.bf16.msra.mxu1 %v845_v49 }
 0x115   :  { %v224_v5 = vpop.f32.mrf.mxu0 }
 0x116   :  { %v225_v6 = vadd.f32 %v224_v5, %v103_v3 }
 0x117   :  { %v226_v7 = vpop.f32.mrf.mxu0 }
 0x118   :  { %v227_v8 = vadd.f32 %v226_v7, %v107_v4  ;;  %v231_v9 = vmax.f32 %v225_v6, 0.0 }
 0x119   :  { %v228_v10 = vpop.f32.mrf.mxu0 }
 0x11a   :  { %v232_v11 = vmax.f32 %v227_v8, 0.0  ;;  %v233_v14 = vpack.c.bf16 %v231_v9, %v231_v9 }
 0x11b   :  { %v229_v12 = vpop.f32.mrf.mxu0 }
 0x11c   :  { %v234_v13 = vpack.c.bf16 %v232_v11, %v232_v11 }
 0x11e   :  { %471 = vmatprep.mubr.bf16.mxu1 %v234_v13 }
 0x11f   :  { %472 = vmatmul.mubr.bf16.vlgmr.msra.gmra.mxu1 %v233_v14 }
 0x1df   :  { %v473_v22 = vpop.f32.mrf.mxu1 }
 0x1e0   :  { %v474_v23 = vadd.f32 %v473_v22, %v272_v20 }
 0x1e1   :  { %v475_v24 = vpop.f32.mrf.mxu1 }
 0x1e2   :  { %v476_v25 = vadd.f32 %v475_v24, %v276_v21  ;;  %v480_v26 = vmax.f32 %v474_v23, 0.0 }
 0x1e3   :  { %v477_v27 = vpop.f32.mrf.mxu1 }
 0x1e4   :  { %v481_v28 = vmax.f32 %v476_v25, 0.0  ;;  %v482_v31 = vpack.c.bf16 %v480_v26, %v480_v26 }
 0x1e5   :  { %v478_v29 = vpop.f32.mrf.mxu1 }
 0x1e6   :  { %v483_v30 = vpack.c.bf16 %v481_v28, %v481_v28 }
 0x1e8   :  { %651 = vmatprep.mubr.bf16.mxu0 %v483_v30 }
 0x1e9   :  { %652 = vmatmul.mubr.bf16.vlgmr.msra.gmra.mxu0 %v482_v31 }
 0x2a9   :  { %v758_v32 = vpop.f32.mrf.mxu0 }
 0x2ab   :  { %v759_v34 = vpop.f32.mrf.mxu0 }
 0x2ac   :  { %v760_v35 = vadd.f32 %v759_v34, %v758_v32 }
 0x2ad   :  { %v761_v36 = vpop.f32.mrf.mxu0 }
 0x2ae   :  { %v654_v37 = vadd.f32 %v760_v35, %v725_v33 }
 0x2af   :  { %v762_v38 = vpop.f32.mrf.mxu0 }
 0x2b0   :  { %659 = vst [vmem:[#allocation10] sm:$0xff] %v654_v37 }
 0x2b1   :  { %953 = shalt.err (!%p950_p10)
}
 0x2b2   :  { %669 = dma.vmem_to_hbm [thread:$0]  %s667_s26, 128, %s1051_s7, [#allocation4]  }
 0x2b3   :  { %968 = dma.done.wait [#allocation4], 128  }
 0x2b4   :  { %969 = vsyncadd [#allocation4], 4294967168 }
 0x2b5   :  { %673 = vsyncpa [#allocation3], 1 }
 0x2b6   :  { %674 = vsyncpa [#allocation6], 1 }
 0x2b7   :  { %675 = vsyncpa [#allocation9], 1 }
 0x2b8   :  { %676 = vsyncpa [#allocation4], 1 }

</bundles_post_ra>
